<compile_context>
chip_gen: v5e
topology: v5e:2x2
jax: 0.10.0
libtpu: 0.0.40
codegen_flags: <defaults>
</compile_context>

<pallas_src>
import functools

import jax
import jax.numpy as jnp
from jax.experimental import pallas as pl
from jax.experimental.pallas import tpu as pltpu

VMEM_SPEC = pl.BlockSpec(memory_space=pltpu.MemorySpace.VMEM)
VMEM_LIMIT = 32 * 1024 * 1024  # safe on v5e (16 MiB default scoped) and v7x (64 MiB phys)

DIMS = [96, 192, 384, 768]
DEPTHS = [3, 3, 9, 3]
LN_EPS = 1e-6


# ---------------------------------------------------------------------------
# Pallas kernels
# ---------------------------------------------------------------------------

def _gelu(x):
    # tanh-approx GELU (see TODO above); computed in f32
    return 0.5 * x * (1.0 + jnp.tanh(0.7978845608028654 * (x + 0.044715 * x * x * x)))


def _mm_kernel(*refs, act, has_residual, has_ln):
    """y = act( [LN(x)] @ w + b ) [+ residual].

    x optionally layer-normed in f32 (fused block-LN), matmul runs bf16 x bf16 on the
    MXU with f32 accumulation; bias / activation / residual add in f32.
    """
    x_ref, w_ref, b_ref = refs[0], refs[1], refs[2]
    n = 3
    if has_ln:
        lnw_ref, lnb_ref = refs[3], refs[4]
        n = 5
    if has_residual:
        r_ref = refs[n]
        n += 1
    o_ref = refs[n]

    if has_ln:
        xf = x_ref[...].astype(jnp.float32)
        mu = jnp.mean(xf, axis=-1, keepdims=True)
        xc = xf - mu
        var = jnp.mean(xc * xc, axis=-1, keepdims=True)
        xf = xc * jax.lax.rsqrt(var + LN_EPS)
        xf = xf * lnw_ref[...] + lnb_ref[...]
        xb = xf.astype(jnp.bfloat16)
    else:
        xb = x_ref[...].astype(jnp.bfloat16)

    y = jnp.dot(xb, w_ref[...], preferred_element_type=jnp.float32)
    y = y + b_ref[...]
    if act == "relu":
        y = jnp.maximum(y, 0.0)
    elif act == "gelu":
        y = _gelu(y)
    if has_residual:
        y = y + r_ref[...].astype(jnp.float32)
    o_ref[...] = y.astype(o_ref.dtype)


def _ln_kernel(x_ref, w_ref, b_ref, o_ref, *, eps):
    """Standalone LayerNorm over the last (channel) dim of a (TM, C) tile."""
    x = x_ref[...].astype(jnp.float32)
    mu = jnp.mean(x, axis=-1, keepdims=True)
    xc = x - mu
    var = jnp.mean(xc * xc, axis=-1, keepdims=True)
    y = xc * jax.lax.rsqrt(var + eps)
    o_ref[...] = (y * w_ref[...] + b_ref[...]).astype(o_ref.dtype)


def _dwconv7_kernel(x_ref, w_ref, b_ref, o_ref, xp_ref, *, H, W, C):
    """Depthwise 7x7 conv, padding=3 done in a VMEM scratch (no XLA pad pass).

    4 independent partial accumulators break the 49-deep serial add chain; one batch
    element per (parallel) grid step.
    """
    # build zero-padded map in VMEM scratch
    xp_ref[...] = jnp.zeros_like(xp_ref)
    xp_ref[3:3 + H, 3:3 + W, :] = x_ref[0].astype(jnp.float32)
    xpad = xp_ref[...]                                   # (H+6, W+6, C)

    w = w_ref[...].astype(jnp.float32)                   # (49, C)
    accs = [jnp.zeros((H, W, C), jnp.float32) for _ in range(4)]
    for dh in range(7):
        row = xpad[dh:dh + H, :, :]                      # hoist row strip (H, W+6, C)
        for dw in range(7):
            k = dh * 7 + dw
            tap = w[k].reshape(1, 1, C)
            accs[k % 4] = accs[k % 4] + row[:, dw:dw + W, :] * tap
    acc = (accs[0] + accs[1]) + (accs[2] + accs[3])
    o_ref[0] = (acc + b_ref[...].reshape(1, 1, C)).astype(o_ref.dtype)


def _head_kernel(x_ref, lnw_ref, lnb_ref, w1_ref, b1_ref, w2_ref, b2_ref, o_ref):
    """Fused head: per-pixel channel LN -> global avg pool -> dense1+ReLU -> cls+softmax."""
    x = x_ref[...].astype(jnp.float32)                   # (B, HW, C)
    mu = jnp.mean(x, axis=-1, keepdims=True)
    xc = x - mu
    var = jnp.mean(xc * xc, axis=-1, keepdims=True)
    xn = xc * jax.lax.rsqrt(var + LN_EPS)
    xn = xn * lnw_ref[...].reshape(1, 1, -1) + lnb_ref[...].reshape(1, 1, -1)

    feats = jnp.mean(xn, axis=1)                         # (B, C)  -- GAP
    h = jnp.dot(feats.astype(jnp.bfloat16), w1_ref[...],
                preferred_element_type=jnp.float32) + b1_ref[...]
    h = jnp.maximum(h, 0.0)
    # dropout(0.3) is identity at inference
    logits = jnp.dot(h.astype(jnp.bfloat16), w2_ref[...],
                     preferred_element_type=jnp.float32) + b2_ref[...]
    logits = logits - jnp.max(logits, axis=-1, keepdims=True)
    e = jnp.exp(logits)
    o_ref[...] = (e / jnp.sum(e, axis=-1, keepdims=True)).astype(o_ref.dtype)


# ---------------------------------------------------------------------------
# Pallas-call wrappers
# ---------------------------------------------------------------------------

def _pick_tm(M):
    for tm in (512, 256, 128):
        if M > tm and M % tm == 0:
            return tm
    return M


def matmul_pallas(x, w, b, act="none", residual=None, ln=None, out_dtype=jnp.float32):
    M, K = x.shape
    N = w.shape[1]
    TM = _pick_tm(M)

    args = [x, w.astype(jnp.bfloat16), b.reshape(1, N).astype(jnp.float32)]
    in_specs = [
        pl.BlockSpec((TM, K), lambda i: (i, 0)),
        pl.BlockSpec((K, N), lambda i: (0, 0)),
        pl.BlockSpec((1, N), lambda i: (0, 0)),
    ]
    if ln is not None:
        lw, lb = ln
        args += [lw.reshape(1, K).astype(jnp.float32), lb.reshape(1, K).astype(jnp.float32)]
        in_specs += [pl.BlockSpec((1, K), lambda i: (0, 0)),
                     pl.BlockSpec((1, K), lambda i: (0, 0))]
    if residual is not None:
        args.append(residual)
        in_specs.append(pl.BlockSpec((TM, N), lambda i: (i, 0)))

    kernel = functools.partial(_mm_kernel, act=act,
                               has_residual=residual is not None,
                               has_ln=ln is not None)
    return pl.pallas_call(
        kernel,
        grid=(M // TM,),
        in_specs=in_specs,
        out_specs=pl.BlockSpec((TM, N), lambda i: (i, 0)),
        out_shape=jax.ShapeDtypeStruct((M, N), out_dtype),
        compiler_params=pltpu.CompilerParams(
            dimension_semantics=("parallel",),
            vmem_limit_bytes=VMEM_LIMIT),
    )(*args)


def layernorm_pallas(x, w, b, eps=LN_EPS):
    shp = x.shape
    C = shp[-1]
    x2 = x.reshape(-1, C)
    M = x2.shape[0]
    TM = _pick_tm(M)
    y = pl.pallas_call(
        functools.partial(_ln_kernel, eps=eps),
        grid=(M // TM,),
        in_specs=[pl.BlockSpec((TM, C), lambda i: (i, 0)),
                  pl.BlockSpec((1, C), lambda i: (0, 0)),
                  pl.BlockSpec((1, C), lambda i: (0, 0))],
        out_specs=pl.BlockSpec((TM, C), lambda i: (i, 0)),
        out_shape=jax.ShapeDtypeStruct((M, C), jnp.float32),
        compiler_params=pltpu.CompilerParams(
            dimension_semantics=("parallel",),
            vmem_limit_bytes=VMEM_LIMIT),
    )(x2, w.reshape(1, C), b.reshape(1, C))
    return y.reshape(shp)


def dwconv7_pallas(x, w49, b, out_dtype=jnp.bfloat16):
    """x: (B,H,W,C) NHWC, w49: (49,C), b: (1,C).  7x7 depthwise, padding=3."""
    B, H, W, C = x.shape
    kernel = functools.partial(_dwconv7_kernel, H=H, W=W, C=C)
    return pl.pallas_call(
        kernel,
        grid=(B,),
        in_specs=[
            pl.BlockSpec((1, H, W, C), lambda bi: (bi, 0, 0, 0)),
            pl.BlockSpec((49, C), lambda bi: (0, 0)),
            pl.BlockSpec((1, C), lambda bi: (0, 0)),
        ],
        out_specs=pl.BlockSpec((1, H, W, C), lambda bi: (bi, 0, 0, 0)),
        out_shape=jax.ShapeDtypeStruct((B, H, W, C), out_dtype),
        scratch_shapes=[pltpu.VMEM((H + 6, W + 6, C), jnp.float32)],
        compiler_params=pltpu.CompilerParams(
            dimension_semantics=("parallel",),
            vmem_limit_bytes=VMEM_LIMIT),
    )(x, w49, b)


def patch_conv_pallas(x, w, b, patch):
    """Conv2d with kernel_size == stride == `patch` (non-overlapping patches):
    space-to-depth (XLA glue) + M-tiled Pallas MXU matmul (hot path)."""
    B, H, W, Cin = x.shape
    Ho, Wo = H // patch, W // patch
    Cout = w.shape[-1]
    xp = x.reshape(B, Ho, patch, Wo, patch, Cin).transpose(0, 1, 3, 2, 4, 5)
    xp = xp.reshape(B * Ho * Wo, patch * patch * Cin)
    wm = w.reshape(patch * patch * Cin, Cout)
    y = matmul_pallas(xp, wm, b, act="none", out_dtype=jnp.float32)
    return y.reshape(B, Ho, Wo, Cout)


def head_pallas(x, ln_w, ln_b, w1, b1, w2, b2):
    """Fused: final channel LN -> GAP -> Linear+ReLU -> (dropout=id) -> Linear+softmax."""
    B, H, W, C = x.shape
    nc = w2.shape[1]
    return pl.pallas_call(
        _head_kernel,
        in_specs=[VMEM_SPEC] * 7,
        out_specs=VMEM_SPEC,
        out_shape=jax.ShapeDtypeStruct((B, nc), jnp.float32),
    )(x.reshape(B, H * W, C),
      ln_w.reshape(1, C), ln_b.reshape(1, C),
      w1.astype(jnp.bfloat16), b1.reshape(1, -1).astype(jnp.float32),
      w2.astype(jnp.bfloat16), b2.reshape(1, -1).astype(jnp.float32))


# ---------------------------------------------------------------------------
# Parameter construction (deterministic, synthetic)
# ---------------------------------------------------------------------------

def init_params(key, num_classes=10):
    keys = iter(jax.random.split(key, 256))

    def nrm(shape, scale=0.02):
        return scale * jax.random.normal(next(keys), shape, jnp.float32)

    def ones(*s):
        return jnp.ones(s, jnp.float32)

    def zeros(*s):
        return jnp.zeros(s, jnp.float32)

    p = {}
    p["stem_w"] = nrm((4, 4, 3, DIMS[0]))            # (kh, kw, Cin, Cout)
    p["stem_b"] = zeros(DIMS[0])
    p["stem_ln_w"], p["stem_ln_b"] = ones(DIMS[0]), zeros(DIMS[0])

    stages = []
    for i, (dim, depth) in enumerate(zip(DIMS, DEPTHS)):
        st = {}
        if i > 0:
            st["ds_ln_w"], st["ds_ln_b"] = ones(DIMS[i - 1]), zeros(DIMS[i - 1])
            st["ds_w"] = nrm((2, 2, DIMS[i - 1], dim))
            st["ds_b"] = zeros(dim)
        blocks = []
        for _ in range(depth):
            blocks.append({
                "dw_w": nrm((49, dim)),               # (7*7, C) depthwise taps
                "dw_b": zeros(1, dim),
                "ln_w": ones(dim), "ln_b": zeros(dim),
                "pw1_w": nrm((dim, 4 * dim)), "pw1_b": zeros(4 * dim),
                "pw2_w": nrm((4 * dim, dim)), "pw2_b": zeros(dim),
                "gamma": jnp.full((dim,), 1e-6, jnp.float32),   # layer scale
            })
        st["blocks"] = blocks
        stages.append(st)
    p["stages"] = stages

    p["final_ln_w"], p["final_ln_b"] = ones(DIMS[-1]), zeros(DIMS[-1])   # head norm
    p["dense1_w"] = nrm((DIMS[-1], 256))
    p["dense1_b"] = zeros(256)
    p["cls_w"] = nrm((256, num_classes))
    p["cls_b"] = zeros(num_classes)
    return p


# ---------------------------------------------------------------------------
# Forward pass (ConvNeXtModel.forward semantics)
# ---------------------------------------------------------------------------

def convnext_model_forward(params, x_nchw):
    # PyTorch gives NCHW; kernels compute in NHWC.
    x = jnp.transpose(x_nchw, (0, 2, 3, 1)).astype(jnp.float32)   # (B, H, W, 3)

    # --- stem: Conv2d(3, 96, k=4, s=4) + LayerNorm(96) ---
    x = patch_conv_pallas(x, params["stem_w"], params["stem_b"], patch=4)
    x = layernorm_pallas(x, params["stem_ln_w"], params["stem_ln_b"])

    # --- 4 stages ---
    for i, st in enumerate(params["stages"]):
        if i > 0:
            x = layernorm_pallas(x, st["ds_ln_w"], st["ds_ln_b"])
            x = patch_conv_pallas(x, st["ds_w"], st["ds_b"], patch=2)
        for blk in st["blocks"]:
            B, H, W, C = x.shape
            shortcut = x.reshape(B * H * W, C)                         # f32 residual stream
            # depthwise 7x7 (+bias), bf16 hand-off
            y = dwconv7_pallas(x, blk["dw_w"], blk["dw_b"], out_dtype=jnp.bfloat16)
            y2 = y.reshape(B * H * W, C)
            # fused: LayerNorm prologue + pwconv1 + GELU (bf16 MXU, bf16 hand-off)
            y2 = matmul_pallas(y2, blk["pw1_w"], blk["pw1_b"], act="gelu",
                               ln=(blk["ln_w"], blk["ln_b"]), out_dtype=jnp.bfloat16)
            # fold layer-scale gamma into pwconv2 weights/bias, fuse residual add (f32 out)
            w2 = blk["pw2_w"] * blk["gamma"][None, :]
            b2 = blk["pw2_b"] * blk["gamma"]
            y2 = matmul_pallas(y2, w2, b2, act="none", residual=shortcut,
                               out_dtype=jnp.float32)
            x = y2.reshape(B, H, W, C)

    # --- fused head: channel LN on map (timm head norm, channels-first LN per pixel),
    #     AdaptiveAvgPool2d(1)+flatten, dense1+ReLU, dropout(eval)=id, classifier+softmax ---
    out = head_pallas(x, params["final_ln_w"], params["final_ln_b"],
                      params["dense1_w"], params["dense1_b"],
                      params["cls_w"], params["cls_b"])
    return out


# ---------------------------------------------------------------------------

if __name__ == "__main__":
    num_classes = 10
    key = jax.random.PRNGKey(0)
    pkey, xkey = jax.random.split(key)

    params = init_params(pkey, num_classes=num_classes)
    # NCHW input, spatial must be divisible by 32 (stem /4, three downsamples /2)
    x = jax.random.normal(xkey, (2, 3, 64, 64), jnp.float32)

    out = convnext_model_forward(params, x)
    out = jax.block_until_ready(out)

    assert out.shape == (2, num_classes), out.shape
    assert bool(jnp.all(jnp.isfinite(out)))
    # softmax rows should sum to ~1
    assert bool(jnp.all(jnp.abs(jnp.sum(out, axis=1) - 1.0) < 1e-4))
    print("KERNEL_OK")
</pallas_src>

<mosaic_0001>
module attributes {stable_mosaic.version = 11 : i64} {
  func.func @_mm_kernel(%arg0: i32, %arg1: memref<256x48xf32, #tpu.memory_space<vmem>>, %arg2: memref<48x96xbf16, #tpu.memory_space<vmem>>, %arg3: memref<1x96xf32, #tpu.memory_space<vmem>>, %arg4: memref<256x96xf32, #tpu.memory_space<vmem>>) attributes {dimension_semantics = [#tpu.dimension_semantics<parallel>], iteration_bounds = array<i64: 2>, scalar_prefetch = 0 : i64, scratch_operands = 0 : i64, tpu.core_type = #tpu.core_type<tc>, window_params = [{transform_indices = @transform_0, window_bounds = array<i64: 256, 48>}, {pipeline_mode = #tpu.pipeline_mode<synchronous>, transform_indices = @transform_1, window_bounds = array<i64: 48, 96>}, {pipeline_mode = #tpu.pipeline_mode<synchronous>, transform_indices = @transform_2, window_bounds = array<i64: 1, 96>}, {transform_indices = @transform_3, window_bounds = array<i64: 256, 96>}]} {
    %c0 = arith.constant 0 : index
    %c0_0 = arith.constant 0 : index
    %0 = vector.load %arg1[%c0, %c0_0] : memref<256x48xf32, #tpu.memory_space<vmem>>, vector<256x48xf32>
    %1 = arith.truncf %0 : vector<256x48xf32> to vector<256x48xbf16>
    %c0_1 = arith.constant 0 : index
    %c0_2 = arith.constant 0 : index
    %2 = vector.load %arg2[%c0_1, %c0_2] : memref<48x96xbf16, #tpu.memory_space<vmem>>, vector<48x96xbf16>
    %cst = arith.constant dense<0.000000e+00> : vector<256x96xf32>
    %3 = tpu.matmul %1, %2, %cst {dimension_numbers = #tpu.dot_dimension_numbers<[1], [0], [0], [1], [0, 0, 1, 1], [], []>} : vector<256x48xbf16>, vector<48x96xbf16>, vector<256x96xf32> -> vector<256x96xf32>
    %c0_3 = arith.constant 0 : index
    %c0_4 = arith.constant 0 : index
    %4 = vector.load %arg3[%c0_3, %c0_4] : memref<1x96xf32, #tpu.memory_space<vmem>>, vector<1x96xf32>
    %5 = vector.broadcast %4 : vector<1x96xf32> to vector<256x96xf32>
    %6 = arith.addf %3, %5 : vector<256x96xf32>
    %c0_5 = arith.constant 0 : index
    %c0_6 = arith.constant 0 : index
    %7 = vector.load %arg4[%c0_5, %c0_6] : memref<256x96xf32, #tpu.memory_space<vmem>>, vector<256x96xf32>
    tpu.vector_store %arg4[%c0_5, %c0_6], %6 {strides = array<i32>} : memref<256x96xf32, #tpu.memory_space<vmem>>, vector<256x96xf32>,
    return
  }
  func.func @transform_0(%arg0: i32) -> (i32, i32) {
    %c0_i32 = arith.constant 0 : i32
    %c0_i32_0 = arith.constant 0 : i32
    return %arg0, %c0_i32 : i32, i32
  }
  func.func @transform_1(%arg0: i32) -> (i32, i32) {
    %c0_i32 = arith.constant 0 : i32
    %c0_i32_0 = arith.constant 0 : i32
    %c0_i32_1 = arith.constant 0 : i32
    return %c0_i32, %c0_i32_0 : i32, i32
  }
  func.func @transform_2(%arg0: i32) -> (i32, i32) {
    %c0_i32 = arith.constant 0 : i32
    %c0_i32_0 = arith.constant 0 : i32
    %c0_i32_1 = arith.constant 0 : i32
    return %c0_i32, %c0_i32_0 : i32, i32
  }
  func.func @transform_3(%arg0: i32) -> (i32, i32) {
    %c0_i32 = arith.constant 0 : i32
    %c0_i32_0 = arith.constant 0 : i32
    return %arg0, %c0_i32 : i32, i32
  }
}

</mosaic_0001>

<bundles_post_ra>
// kernel: tpu_custom_call.1
= control target key start
LH: loop header
LB: loop body
LE: loop exit
PB: predicated region body
PF: predicated region fallthrough
CT: control target
= control target key end

     0   :  { %s566_s12 = smov 0   ;;  %s752_s0 = inlined_call_operand.vmem [shape: f32[512,48], index: 0, kind: input, shape index: {}]   ;;  %s753_s1 = inlined_call_operand.vmem [shape: bf16[48,96], index: 1, kind: input, shape index: {}]   ;;  %s754_s2 = inlined_call_operand.vmem [shape: f32[1,96], index: 2, kind: input, shape index: {}]   ;;  %s755_s3 = inlined_call_operand.vmem [shape: f32[512,96], index: 3, kind: output, shape index: {}]  }
   0x1 LB: > { %s478_s13 = sadd.s32 4294967295, %s544_s12   ;;  %p482_p0 = scmp.ge.s32.totalorder %s544_s12, 1  ;;  %s544_s12 = sphi %s566_s12, %s13_s12  }
   0x2   : > { %p138_p1 = scmp.lt.s32.totalorder %s544_s12, 3 }
   0x4   : > { %p139_p2 = pnand %p482_p0, %p138_p1 }
   0x5   : > { %s483_s16 = sshll.u32 (!%p139_p2), %s478_s13, 5 }
   0x6   : > { %142 = sbr.rel (%p139_p2) target bundleno = 216 (0xd8), region = 32  ;;  %p163_p3 = scmp.lt.s32.totalorder (!%p139_p2), %s483_s16, 63 }
   0xb   : > { %v519_v0 = vld [vmem:[%s753_s1 + $0x10] sm:$0xff]  ;;  %v518_v1 = vld [vmem:[%s753_s1 + $0x8] sm:$0xff]  ;;  %s757_s16 = smov (!%p163_p3, %s483_s16), 63  ;;  %v517_v2 = vld [vmem:[%s753_s1] sm:$0xff]  ;;  %vm251_vm0 = vcmask 392192   ;;  %vm389_vm1 = vcmask 785408  }
   0xc   : > { %305 = vmatpush.bf16.msra.mxu0 %v519_v0  ;;  %520 = vmatpush.bf16.msra.mxu1 %v519_v0  ;;  %s484_s19 = sshll.u32 %s757_s16, 3  ;;  %v644_v51 = vld [vmem:[%s754_s2] ss:$0 sm:$0xff] }
   0xd   : > { %521 = vmatpush.bf16.msra.mxu2 %v519_v0  ;;  %522 = vmatpush.bf16.msra.mxu3 %v519_v0  ;;  %s591_s24 = scalar_lea.vmem %s752_s0, %s484_s19  ;;  %s651_s29 = scalar_lea.vmem %s755_s3, %s484_s19 }
   0xe   : > { %v175_v3 = vld [vmem:[%s591_s24] sm:$0xff]  ;;  %v176_v4 = vld [vmem:[%s591_s24 + $0x8] sm:$0xff]  ;;  %v177_v15 = vld [vmem:[%s591_s24 + $0x10] sm:$0xff] }
   0xf   : > { %v183_v5 = vld [vmem:[%s591_s24 + $0x40] sm:$0xff]  ;;  %v184_v6 = vld [vmem:[%s591_s24 + $0x48] sm:$0xff]  ;;  %v207_v9 = vpack.c.bf16 %v176_v4, %v175_v3  ;;  %v178_v16 = vld [vmem:[%s591_s24 + $0x18] sm:$0xff] }
  0x10   : > { %306 = vmatpush.bf16.msra.mxu0 %v518_v1  ;;  %523 = vmatpush.bf16.msra.mxu1 %v518_v1  ;;  %v191_v7 = vld [vmem:[%s591_s24 + $0x80] sm:$0xff]  ;;  %v192_v8 = vld [vmem:[%s591_s24 + $0x88] sm:$0xff]  ;;  %v211_v10 = vpack.c.bf16 %v184_v6, %v183_v5  ;;  %v185_v17 = vld [vmem:[%s591_s24 + $0x50] sm:$0xff]  ;;  %v208_v23 = vpack.c.bf16 %v178_v16, %v177_v15 }
  0x11   : > { %524 = vmatpush.bf16.msra.mxu2 %v518_v1  ;;  %525 = vmatpush.bf16.msra.mxu3 %v518_v1  ;;  %v199_v11 = vld [vmem:[%s591_s24 + $0xc0] sm:$0xff]  ;;  %v200_v12 = vld [vmem:[%s591_s24 + $0xc8] sm:$0xff]  ;;  %v215_v13 = vpack.c.bf16 %v192_v8, %v191_v7  ;;  %v186_v18 = vld [vmem:[%s591_s24 + $0x58] sm:$0xff] }
  0x12   : > { %v219_v14 = vpack.c.bf16 %v200_v12, %v199_v11  ;;  %v193_v19 = vld [vmem:[%s591_s24 + $0x90] sm:$0xff]  ;;  %v194_v20 = vld [vmem:[%s591_s24 + $0x98] sm:$0xff]  ;;  %v212_v24 = vpack.c.bf16 %v186_v18, %v185_v17  ;;  %v179_v27 = vld [vmem:[%s591_s24 + $0x20] sm:$0xff] }
  0x13   : > { %v201_v21 = vld [vmem:[%s591_s24 + $0xd0] sm:$0xff]  ;;  %v202_v22 = vld [vmem:[%s591_s24 + $0xd8] sm:$0xff]  ;;  %v216_v25 = vpack.c.bf16 %v194_v20, %v193_v19  ;;  %v180_v28 = vld [vmem:[%s591_s24 + $0x28] sm:$0xff] }
  0x14   : > { %307 = vmatpush.bf16.msra.mxu0 %v517_v2  ;;  %526 = vmatpush.bf16.msra.mxu1 %v517_v2  ;;  %v220_v26 = vpack.c.bf16 %v202_v22, %v201_v21  ;;  %v187_v29 = vld [vmem:[%s591_s24 + $0x60] sm:$0xff]  ;;  %v188_v30 = vld [vmem:[%s591_s24 + $0x68] sm:$0xff]  ;;  %v209_v35 = vpack.c.bf16 %v180_v28, %v179_v27  ;;  %v181_v39 = vld [vmem:[%s591_s24 + $0x30] sm:$0xff] }
  0x15   : > { %527 = vmatpush.bf16.msra.mxu2 %v517_v2  ;;  %528 = vmatpush.bf16.msra.mxu3 %v517_v2  ;;  %v195_v31 = vld [vmem:[%s591_s24 + $0xa0] sm:$0xff]  ;;  %v196_v32 = vld [vmem:[%s591_s24 + $0xa8] sm:$0xff]  ;;  %v213_v36 = vpack.c.bf16 %v188_v30, %v187_v29  ;;  %v182_v40 = vld [vmem:[%s591_s24 + $0x38] sm:$0xff] }
  0x16   : > { %v203_v33 = vld [vmem:[%s591_s24 + $0xe0] sm:$0xff]  ;;  %v204_v34 = vld [vmem:[%s591_s24 + $0xe8] sm:$0xff]  ;;  %v217_v37 = vpack.c.bf16 %v196_v32, %v195_v31  ;;  %v189_v41 = vld [vmem:[%s591_s24 + $0x70] sm:$0xff]  ;;  %v210_v47 = vpack.c.bf16 %v182_v40, %v181_v39 }
  0x17   : > { %499 = vmatmul.msk.bf16.vlgmr.msra.gmra.mxu0 %vm251_vm0, %v207_v9  ;;  %503 = vmatmul.msk.bf16.vlgmr.msra.gmra.mxu1 %vm251_vm0, %v211_v10  ;;  %v221_v38 = vpack.c.bf16 %v204_v34, %v203_v33  ;;  %v190_v42 = vld [vmem:[%s591_s24 + $0x78] sm:$0xff]  ;;  %v197_v43 = vld [vmem:[%s591_s24 + $0xb0] sm:$0xff] }
  0x18   : > { %507 = vmatmul.msk.bf16.vlgmr.msra.gmra.mxu2 %vm251_vm0, %v215_v13  ;;  %511 = vmatmul.msk.bf16.vlgmr.msra.gmra.mxu3 %vm251_vm0, %v219_v14  ;;  %v198_v44 = vld [vmem:[%s591_s24 + $0xb8] sm:$0xff]  ;;  %v205_v45 = vld [vmem:[%s591_s24 + $0xf0] sm:$0xff]  ;;  %v214_v48 = vpack.c.bf16 %v190_v42, %v189_v41 }
  0x19   : > { %v206_v46 = vld [vmem:[%s591_s24 + $0xf8] sm:$0xff]  ;;  %v218_v49 = vpack.c.bf16 %v198_v44, %v197_v43 }
  0x1a   : > { %v222_v50 = vpack.c.bf16 %v206_v46, %v205_v45 }
  0x27   : > { %500 = vmatmul.msk.bf16.gmra.mxu0 %vm251_vm0, %v208_v23  ;;  %504 = vmatmul.msk.bf16.gmra.mxu1 %vm251_vm0, %v212_v24 }
  0x28   : > { %508 = vmatmul.msk.bf16.gmra.mxu2 %vm251_vm0, %v216_v25  ;;  %512 = vmatmul.msk.bf16.gmra.mxu3 %vm251_vm0, %v220_v26 }
  0x37   : > { %501 = vmatmul.msk.bf16.gmra.mxu0 %vm251_vm0, %v209_v35  ;;  %505 = vmatmul.msk.bf16.gmra.mxu1 %vm251_vm0, %v213_v36 }
  0x38   : > { %509 = vmatmul.msk.bf16.gmra.mxu2 %vm251_vm0, %v217_v37  ;;  %513 = vmatmul.msk.bf16.gmra.mxu3 %vm251_vm0, %v221_v38 }
  0x47   : > { %502 = vmatmul.msk.bf16.gmra.mxu0 %vm251_vm0, %v210_v47  ;;  %506 = vmatmul.msk.bf16.gmra.mxu1 %vm251_vm0, %v214_v48 }
  0x48   : > { %510 = vmatmul.msk.bf16.gmra.mxu2 %vm251_vm0, %v218_v49  ;;  %514 = vmatmul.msk.bf16.gmra.mxu3 %vm251_vm0, %v222_v50 }
  0x94   : > { %v309_v52 = vpop.f32.mrf.mxu0  ;;  %v329_v53 = vpop.f32.mrf.mxu1 }
  0x95   : > { %v310_v54 = vadd.f32 %v644_v51, %v309_v52  ;;  %v330_v55 = vadd.f32 %v644_v51, %v329_v53 }
  0x97   : > { %390 = vst.msk [vmem:[%s651_s29] sm:$0xff] %vm389_vm1, %v310_v54 }
  0x98   : > { %398 = vst.msk [vmem:[%s651_s29 + $0x40] sm:$0xff] %vm389_vm1, %v330_v55 }
  0x9b   : > { %v349_v56 = vpop.f32.mrf.mxu2  ;;  %v369_v57 = vpop.f32.mrf.mxu3 }
  0x9c   : > { %v350_v58 = vadd.f32 %v644_v51, %v349_v56  ;;  %v370_v59 = vadd.f32 %v644_v51, %v369_v57  ;;  %v311_v60 = vpop.f32.mrf.mxu0  ;;  %v331_v61 = vpop.f32.mrf.mxu1 }
  0x9d   : > { %v312_v62 = vadd.f32 %v644_v51, %v311_v60  ;;  %v332_v63 = vadd.f32 %v644_v51, %v331_v61 }
  0x9e   : > { %406 = vst.msk [vmem:[%s651_s29 + $0x80] sm:$0xff] %vm389_vm1, %v350_v58 }
  0x9f   : > { %414 = vst.msk [vmem:[%s651_s29 + $0xc0] sm:$0xff] %vm389_vm1, %v370_v59 }
  0xa0   : > { %391 = vst.msk [vmem:[%s651_s29 + $0x8] sm:$0xff] %vm389_vm1, %v312_v62 }
  0xa1   : > { %399 = vst.msk [vmem:[%s651_s29 + $0x48] sm:$0xff] %vm389_vm1, %v332_v63 }
  0xa3   : > { %v351_v0 = vpop.f32.mrf.mxu2  ;;  %v371_v1 = vpop.f32.mrf.mxu3 }
  0xa4   : > { %v352_v2 = vadd.f32 %v644_v51, %v351_v0  ;;  %v372_v3 = vadd.f32 %v644_v51, %v371_v1  ;;  %v314_v4 = vpop.f32.mrf.mxu0  ;;  %v334_v5 = vpop.f32.mrf.mxu1 }
  0xa5   : > { %v315_v6 = vadd.f32 %v644_v51, %v314_v4  ;;  %v335_v7 = vadd.f32 %v644_v51, %v334_v5 }
  0xa6   : > { %407 = vst.msk [vmem:[%s651_s29 + $0x88] sm:$0xff] %vm389_vm1, %v352_v2 }
  0xa7   : > { %415 = vst.msk [vmem:[%s651_s29 + $0xc8] sm:$0xff] %vm389_vm1, %v372_v3 }
  0xa8   : > { %392 = vst.msk [vmem:[%s651_s29 + $0x10] sm:$0xff] %vm389_vm1, %v315_v6 }
  0xa9   : > { %400 = vst.msk [vmem:[%s651_s29 + $0x50] sm:$0xff] %vm389_vm1, %v335_v7 }
  0xab   : > { %v354_v8 = vpop.f32.mrf.mxu2  ;;  %v374_v9 = vpop.f32.mrf.mxu3 }
  0xac   : > { %v355_v10 = vadd.f32 %v644_v51, %v354_v8  ;;  %v375_v11 = vadd.f32 %v644_v51, %v374_v9  ;;  %v316_v12 = vpop.f32.mrf.mxu0  ;;  %v336_v13 = vpop.f32.mrf.mxu1 }
  0xad   : > { %v317_v14 = vadd.f32 %v644_v51, %v316_v12  ;;  %v337_v15 = vadd.f32 %v644_v51, %v336_v13 }
  0xae   : > { %408 = vst.msk [vmem:[%s651_s29 + $0x90] sm:$0xff] %vm389_vm1, %v355_v10 }
  0xaf   : > { %416 = vst.msk [vmem:[%s651_s29 + $0xd0] sm:$0xff] %vm389_vm1, %v375_v11 }
  0xb0   : > { %393 = vst.msk [vmem:[%s651_s29 + $0x18] sm:$0xff] %vm389_vm1, %v317_v14 }
  0xb1   : > { %401 = vst.msk [vmem:[%s651_s29 + $0x58] sm:$0xff] %vm389_vm1, %v337_v15 }
  0xb3   : > { %v356_v16 = vpop.f32.mrf.mxu2  ;;  %v376_v17 = vpop.f32.mrf.mxu3 }
  0xb4   : > { %v357_v18 = vadd.f32 %v644_v51, %v356_v16  ;;  %v377_v19 = vadd.f32 %v644_v51, %v376_v17  ;;  %v319_v20 = vpop.f32.mrf.mxu0  ;;  %v339_v21 = vpop.f32.mrf.mxu1 }
  0xb5   : > { %v320_v22 = vadd.f32 %v644_v51, %v319_v20  ;;  %v340_v23 = vadd.f32 %v644_v51, %v339_v21 }
  0xb6   : > { %409 = vst.msk [vmem:[%s651_s29 + $0x98] sm:$0xff] %vm389_vm1, %v357_v18 }
  0xb7   : > { %417 = vst.msk [vmem:[%s651_s29 + $0xd8] sm:$0xff] %vm389_vm1, %v377_v19 }
  0xb8   : > { %394 = vst.msk [vmem:[%s651_s29 + $0x20] sm:$0xff] %vm389_vm1, %v320_v22 }
  0xb9   : > { %402 = vst.msk [vmem:[%s651_s29 + $0x60] sm:$0xff] %vm389_vm1, %v340_v23 }
  0xbb   : > { %v359_v24 = vpop.f32.mrf.mxu2  ;;  %v379_v25 = vpop.f32.mrf.mxu3 }
  0xbc   : > { %v360_v26 = vadd.f32 %v644_v51, %v359_v24  ;;  %v380_v27 = vadd.f32 %v644_v51, %v379_v25  ;;  %v321_v28 = vpop.f32.mrf.mxu0  ;;  %v341_v29 = vpop.f32.mrf.mxu1 }
  0xbd   : > { %v322_v30 = vadd.f32 %v644_v51, %v321_v28  ;;  %v342_v31 = vadd.f32 %v644_v51, %v341_v29 }
  0xbe   : > { %410 = vst.msk [vmem:[%s651_s29 + $0xa0] sm:$0xff] %vm389_vm1, %v360_v26 }
  0xbf   : > { %418 = vst.msk [vmem:[%s651_s29 + $0xe0] sm:$0xff] %vm389_vm1, %v380_v27 }
  0xc0   : > { %395 = vst.msk [vmem:[%s651_s29 + $0x28] sm:$0xff] %vm389_vm1, %v322_v30 }
  0xc1   : > { %403 = vst.msk [vmem:[%s651_s29 + $0x68] sm:$0xff] %vm389_vm1, %v342_v31 }
  0xc3   : > { %v361_v32 = vpop.f32.mrf.mxu2  ;;  %v381_v33 = vpop.f32.mrf.mxu3 }
  0xc4   : > { %v362_v34 = vadd.f32 %v644_v51, %v361_v32  ;;  %v382_v35 = vadd.f32 %v644_v51, %v381_v33  ;;  %v324_v36 = vpop.f32.mrf.mxu0  ;;  %v344_v37 = vpop.f32.mrf.mxu1 }
  0xc5   : > { %v325_v38 = vadd.f32 %v644_v51, %v324_v36  ;;  %v345_v39 = vadd.f32 %v644_v51, %v344_v37 }
  0xc6   : > { %411 = vst.msk [vmem:[%s651_s29 + $0xa8] sm:$0xff] %vm389_vm1, %v362_v34 }
  0xc7   : > { %419 = vst.msk [vmem:[%s651_s29 + $0xe8] sm:$0xff] %vm389_vm1, %v382_v35 }
  0xc8   : > { %396 = vst.msk [vmem:[%s651_s29 + $0x30] sm:$0xff] %vm389_vm1, %v325_v38 }
  0xc9   : > { %404 = vst.msk [vmem:[%s651_s29 + $0x70] sm:$0xff] %vm389_vm1, %v345_v39 }
  0xcb   : > { %v364_v40 = vpop.f32.mrf.mxu2  ;;  %v384_v41 = vpop.f32.mrf.mxu3 }
  0xcc   : > { %v365_v42 = vadd.f32 %v644_v51, %v364_v40  ;;  %v385_v43 = vadd.f32 %v644_v51, %v384_v41  ;;  %v326_v44 = vpop.f32.mrf.mxu0  ;;  %v346_v45 = vpop.f32.mrf.mxu1 }
  0xcd   : > { %v327_v46 = vadd.f32 %v644_v51, %v326_v44  ;;  %v347_v47 = vadd.f32 %v644_v51, %v346_v45 }
  0xce   : > { %412 = vst.msk [vmem:[%s651_s29 + $0xb0] sm:$0xff] %vm389_vm1, %v365_v42 }
  0xcf   : > { %420 = vst.msk [vmem:[%s651_s29 + $0xf0] sm:$0xff] %vm389_vm1, %v385_v43 }
  0xd0   : > { %397 = vst.msk [vmem:[%s651_s29 + $0x38] sm:$0xff] %vm389_vm1, %v327_v46 }
  0xd1   : > { %405 = vst.msk [vmem:[%s651_s29 + $0x78] sm:$0xff] %vm389_vm1, %v347_v47 }
  0xd3   : > { %v366_v48 = vpop.f32.mrf.mxu2  ;;  %v386_v49 = vpop.f32.mrf.mxu3 }
  0xd4   : > { %v367_v50 = vadd.f32 %v644_v51, %v366_v48  ;;  %v387_v52 = vadd.f32 %v644_v51, %v386_v49 }
  0xd6   : > { %413 = vst.msk [vmem:[%s651_s29 + $0xb8] sm:$0xff] %vm389_vm1, %v367_v50 }
  0xd7   : > { %421 = vst.msk [vmem:[%s651_s29 + $0xf8] sm:$0xff] %vm389_vm1, %v387_v52 }
  0xd8 PF: > { %s13_s12 = sadd.s32 1, %s544_s12  }
  0xd9   : > { %p10_p4 = scmp.ge.s32.totalorder %s13_s12, 4  }
  0xdb   :  { %12 = sbr.rel (!%p10_p4) target bundleno = 1 (0x1), region = 62 }

</bundles_post_ra>
